<compile_context>
chip_gen: v7x
topology: tpu7x:2x2x1
jax: 0.10.0
libtpu: 0.0.40
codegen_flags: <defaults>
</compile_context>

<pallas_src>
import jax
import jax.numpy as jnp
from jax import lax
from jax.experimental import pallas as pl
from jax.experimental.pallas import tpu as pltpu


def residual_kernel(x_ref, a1_ref, b1_ref, a2_ref, b2_ref, o_ref):
    # x_ref : (B, H, W*Cin)               bf16 row-flattened input block
    # a1_ref: (3*W*Cin, W*Cmid)           stacked block-Toeplitz conv1 weights
    # b1_ref: (1, W*Cmid)                 f32 conv1 bias row
    # a2_ref: (3*W*Cmid + W*Cin, W*Cout)  stacked conv2 weights + 1x1 shortcut
    # b2_ref: (1, W*Cout)                 f32 (b2 + bs) bias row
    # o_ref : (B, H, W*Cout)              lane-dense output block
    B, H, WCi = x_ref.shape
    WCo = o_ref.shape[-1]

    x3 = x_ref[...]                                           # (B, H, W*Cin)

    # dy = -1 / +1 row taps: slice + one zero row, per image (no cross-image
    # leakage).  Off the MXU slot entirely.
    zci = jnp.zeros((B, 1, WCi), x3.dtype)
    prev = jnp.concatenate([zci, x3[:, :-1, :]], axis=1)      # rows h-1
    nxt = jnp.concatenate([x3[:, 1:, :], zci], axis=1)        # rows h+1

    # conv1: single fused matmul, K = 3*W*Cin, M = B*H, f32 accumulation.
    cat1 = jnp.concatenate([prev, x3, nxt], axis=-1).reshape(B * H, 3 * WCi)
    h1 = jnp.dot(cat1, a1_ref[...], preferred_element_type=jnp.float32)
    h1 = jnp.maximum(h1 + b1_ref[...], 0.0)                   # (B*H, W*Cmid)
    WCm = h1.shape[-1]
    h1 = h1.astype(x3.dtype).reshape(B, H, WCm)

    zcm = jnp.zeros((B, 1, WCm), x3.dtype)
    prev1 = jnp.concatenate([zcm, h1[:, :-1, :]], axis=1)
    nxt1 = jnp.concatenate([h1[:, 1:, :], zcm], axis=1)

    # conv2 + 1x1 shortcut fused: single matmul, K = 3*W*Cmid + W*Cin.
    cat2 = jnp.concatenate([prev1, h1, nxt1, x3], axis=-1)
    cat2 = cat2.reshape(B * H, 3 * WCm + WCi)
    y = jnp.dot(cat2, a2_ref[...], preferred_element_type=jnp.float32)
    out = jnp.maximum(y + b2_ref[...], 0.0)                   # f32 epilogue
    o_ref[...] = out.astype(o_ref.dtype).reshape(B, H, WCo)


def _conv3x3_toeplitz(w, W):
    """w: (3, 3, Ci, Co) HWIO -> (3, W*Ci, W*Co) block-Toeplitz matrices.

    A[dy, v*Ci + ci, u*Co + co] = sum_dx [v == u + dx - 1] * w[dy, dx, ci, co]
    (out-of-range dx taps dropped == SAME zero padding along W).
    """
    kh, kw, Ci, Co = w.shape
    S = jnp.stack([jnp.eye(W, k=1 - dx, dtype=jnp.float32) for dx in range(kw)])
    A = jnp.einsum("xvw,yxio->yviwo", S, w.astype(jnp.float32))
    return A.reshape(kh, W * Ci, W * Co)


def prepare_residual_params(w1, b1, w2, b2, ws, bs, W, dtype=jnp.bfloat16):
    """One-time (parameter-load-time) weight preprocessing.

    Returns (a1s, b1_row, a2s, b2bs_row):
      a1s      : (3*W*Cin, W*Cmid)          fused conv1 weights (dtype)
      a2s      : (3*W*Cmid + W*Cin, W*Cout) fused conv2 + shortcut weights
      b1_row   : (1, W*Cmid)  f32
      b2bs_row : (1, W*Cout)  f32  (b2 + bs)
    """
    Cin, Cmid = w1.shape[2], w1.shape[3]
    Cout = w2.shape[3]
    a1 = _conv3x3_toeplitz(w1, W).reshape(3 * W * Cin, W * Cmid)
    a2 = _conv3x3_toeplitz(w2, W).reshape(3 * W * Cmid, W * Cout)
    a_s = jnp.kron(jnp.eye(W, dtype=jnp.float32),
                   ws.reshape(Cin, Cout).astype(jnp.float32))
    a1s = a1.astype(dtype)
    a2s = jnp.concatenate([a2, a_s], axis=0).astype(dtype)
    b1_row = jnp.tile(b1, W).reshape(1, W * Cmid).astype(jnp.float32)
    b2bs_row = (jnp.tile(b2, W) + jnp.tile(bs, W)).reshape(
        1, W * Cout).astype(jnp.float32)
    return a1s, b1_row, a2s, b2bs_row


def residual_layer_rows(x_rows, params, *, Cin, Cmid, Cout, W, block_n=None):
    """x_rows: (N, H, W*Cin) bf16 row-flattened activations. Returns same layout."""
    a1s, b1_row, a2s, b2bs_row = params
    N, H, WCi = x_rows.shape
    assert WCi == W * Cin

    if block_n is None:
        # Aim for B*H >= ~256 rows per matmul (MXU fill on v6e/v7x), B | N.
        B = max(1, min(N, max(1, 256 // H)))
        while N % B:
            B -= 1
    else:
        B = block_n
    grid = (N // B,)

    return pl.pallas_call(
        residual_kernel,
        out_shape=jax.ShapeDtypeStruct((N, H, W * Cout), x_rows.dtype),
        grid_spec=pltpu.PrefetchScalarGridSpec(
            num_scalar_prefetch=0,
            grid=grid,
            in_specs=[
                pl.BlockSpec((B, H, W * Cin), lambda n: (n, 0, 0)),
                pl.BlockSpec((3 * W * Cin, W * Cmid), lambda n: (0, 0)),
                pl.BlockSpec((1, W * Cmid), lambda n: (0, 0)),
                pl.BlockSpec((3 * W * Cmid + W * Cin, W * Cout),
                             lambda n: (0, 0)),
                pl.BlockSpec((1, W * Cout), lambda n: (0, 0)),
            ],
            out_specs=pl.BlockSpec((B, H, W * Cout), lambda n: (n, 0, 0)),
        ),
        compiler_params=pltpu.CompilerParams(
            dimension_semantics=("parallel",),
            # Tiny at these shapes; re-budget explicitly when W-tiling for
            # production sizes (v7x has only 64 MiB physical VMEM).
            vmem_limit_bytes=32 * 1024 * 1024),
    )(x_rows, a1s, b1_row, a2s, b2bs_row)


def residual_layer(x_nchw, w1, b1, w2, b2, ws, bs):
    """PyTorch-compatible entry: NCHW f32 in, NCHW (bf16) out.

    For a multi-layer network, call prepare_residual_params once per layer
    and chain residual_layer_rows on the (N, H, W*C) layout instead (avoids
    the per-layer NCHW<->rows transposes).
    """
    N, Cin, H, W = x_nchw.shape
    Cmid = w1.shape[3]
    Cout = w2.shape[3]
    params = prepare_residual_params(w1, b1, w2, b2, ws, bs, W)
    x_rows = jnp.transpose(x_nchw, (0, 2, 3, 1)).reshape(
        N, H, W * Cin).astype(jnp.bfloat16)
    out_rows = residual_layer_rows(x_rows, params,
                                   Cin=Cin, Cmid=Cmid, Cout=Cout, W=W)
    return jnp.transpose(out_rows.reshape(N, H, W, Cout), (0, 3, 1, 2))


def _reference(x_nchw, w1, b1, w2, b2, ws, bs):
    """Pure-JAX f32 reference (NHWC conv via lax), PyTorch semantics."""
    x = jnp.transpose(x_nchw, (0, 2, 3, 1))
    dn = lax.conv_dimension_numbers(x.shape, w1.shape, ("NHWC", "HWIO", "NHWC"))
    h = lax.conv_general_dilated(x, w1, (1, 1), "SAME", dimension_numbers=dn) + b1
    h = jnp.maximum(h, 0.0)
    dn2 = lax.conv_dimension_numbers(h.shape, w2.shape, ("NHWC", "HWIO", "NHWC"))
    h = lax.conv_general_dilated(h, w2, (1, 1), "SAME", dimension_numbers=dn2) + b2
    dns = lax.conv_dimension_numbers(x.shape, ws.shape, ("NHWC", "HWIO", "NHWC"))
    r = lax.conv_general_dilated(x, ws, (1, 1), "SAME", dimension_numbers=dns) + bs
    out = jnp.maximum(h + r, 0.0)
    return jnp.transpose(out, (0, 3, 1, 2))


if __name__ == "__main__":
    N, Cin, H, W = 2, 4, 16, 16
    Cmid, Cout = 8, 8

    key = jax.random.PRNGKey(0)
    kx, k1, k2, k3, k4, k5, k6 = jax.random.split(key, 7)

    x = jax.random.normal(kx, (N, Cin, H, W), dtype=jnp.float32)        # NCHW
    # Deterministic synthetic parameters (HWIO layout), not a checkpoint load.
    w1 = jax.random.normal(k1, (3, 3, Cin, Cmid), dtype=jnp.float32) * 0.1
    b1 = jax.random.normal(k2, (Cmid,), dtype=jnp.float32) * 0.1
    w2 = jax.random.normal(k3, (3, 3, Cmid, Cout), dtype=jnp.float32) * 0.1
    b2 = jax.random.normal(k4, (Cout,), dtype=jnp.float32) * 0.1
    ws = jax.random.normal(k5, (1, 1, Cin, Cout), dtype=jnp.float32) * 0.1
    bs = jax.random.normal(k6, (Cout,), dtype=jnp.float32) * 0.1

    out = residual_layer(x, w1, b1, w2, b2, ws, bs)
    out = jax.block_until_ready(out)
    assert out.shape == (N, Cout, H, W)

    # Kernel runs the matmuls in bf16 (f32 accumulation); compare against an
    # f32 reference evaluated on bf16-quantized activations/weights so the
    # check isolates kernel structure from input quantization.
    q = lambda a: a.astype(jnp.bfloat16).astype(jnp.float32)
    ref = jax.block_until_ready(
        _reference(q(x), q(w1), b1, q(w2), b2, q(ws), bs))
    out_f32 = out.astype(jnp.float32)
    assert jnp.allclose(out_f32, ref, atol=3e-2, rtol=3e-2), "mismatch vs reference"

    print("KERNEL_OK")
</pallas_src>

<mosaic_0001>
module attributes {stable_mosaic.version = 11 : i64} {
  func.func @residual_kernel(%arg0: i32, %arg1: memref<2x16x64xbf16, #tpu.memory_space<vmem>>, %arg2: memref<192x128xbf16, #tpu.memory_space<vmem>>, %arg3: memref<1x128xf32, #tpu.memory_space<vmem>>, %arg4: memref<448x128xbf16, #tpu.memory_space<vmem>>, %arg5: memref<1x128xf32, #tpu.memory_space<vmem>>, %arg6: memref<2x16x128xbf16, #tpu.memory_space<vmem>>) attributes {dimension_semantics = [#tpu.dimension_semantics<parallel>], iteration_bounds = array<i64: 1>, scalar_prefetch = 0 : i64, scratch_operands = 0 : i64, tpu.core_type = #tpu.core_type<tc>, window_params = [{transform_indices = @transform_0, window_bounds = array<i64: 2, 16, 64>}, {pipeline_mode = #tpu.pipeline_mode<synchronous>, transform_indices = @transform_1, window_bounds = array<i64: 192, 128>}, {pipeline_mode = #tpu.pipeline_mode<synchronous>, transform_indices = @transform_2, window_bounds = array<i64: 1, 128>}, {pipeline_mode = #tpu.pipeline_mode<synchronous>, transform_indices = @transform_3, window_bounds = array<i64: 448, 128>}, {pipeline_mode = #tpu.pipeline_mode<synchronous>, transform_indices = @transform_4, window_bounds = array<i64: 1, 128>}, {transform_indices = @transform_5, window_bounds = array<i64: 2, 16, 128>}]} {
    %c0 = arith.constant 0 : index
    %c0_0 = arith.constant 0 : index
    %c0_1 = arith.constant 0 : index
    %0 = vector.load %arg1[%c0, %c0_0, %c0_1] : memref<2x16x64xbf16, #tpu.memory_space<vmem>>, vector<2x16x64xbf16>
    %cst = arith.constant 0.000000e+00 : bf16
    %1 = vector.broadcast %cst : bf16 to vector<2x1x64xbf16>
    %2 = vector.extract_strided_slice %0 {offsets = [0, 0, 0], sizes = [2, 15, 64], strides = [1, 1, 1]} : vector<2x16x64xbf16> to vector<2x15x64xbf16>
    %3 = tpu.concatenate %1, %2 in 1 : vector<2x1x64xbf16>, vector<2x15x64xbf16> -> vector<2x16x64xbf16>
    %4 = vector.extract_strided_slice %0 {offsets = [0, 1, 0], sizes = [2, 15, 64], strides = [1, 1, 1]} : vector<2x16x64xbf16> to vector<2x15x64xbf16>
    %5 = tpu.concatenate %4, %1 in 1 : vector<2x15x64xbf16>, vector<2x1x64xbf16> -> vector<2x16x64xbf16>
    %6 = tpu.concatenate %3, %0, %5 in 2 : vector<2x16x64xbf16>, vector<2x16x64xbf16>, vector<2x16x64xbf16> -> vector<2x16x192xbf16>
    %7 = vector.shape_cast %6 : vector<2x16x192xbf16> to vector<32x192xbf16>
    %c0_2 = arith.constant 0 : index
    %c0_3 = arith.constant 0 : index
    %8 = vector.load %arg2[%c0_2, %c0_3] : memref<192x128xbf16, #tpu.memory_space<vmem>>, vector<192x128xbf16>
    %cst_4 = arith.constant dense<0.000000e+00> : vector<32x128xf32>
    %9 = tpu.matmul %7, %8, %cst_4 {dimension_numbers = #tpu.dot_dimension_numbers<[1], [0], [0], [1], [0, 0, 1, 1], [], []>} : vector<32x192xbf16>, vector<192x128xbf16>, vector<32x128xf32> -> vector<32x128xf32>
    %c0_5 = arith.constant 0 : index
    %c0_6 = arith.constant 0 : index
    %10 = vector.load %arg3[%c0_5, %c0_6] : memref<1x128xf32, #tpu.memory_space<vmem>>, vector<1x128xf32>
    %11 = vector.broadcast %10 : vector<1x128xf32> to vector<32x128xf32>
    %12 = arith.addf %9, %11 : vector<32x128xf32>
    %cst_7 = arith.constant 0.000000e+00 : f32
    %13 = vector.broadcast %cst_7 : f32 to vector<32x128xf32>
    %14 = arith.maximumf %12, %13 : vector<32x128xf32>
    %15 = arith.truncf %14 : vector<32x128xf32> to vector<32x128xbf16>
    %16 = vector.shape_cast %15 : vector<32x128xbf16> to vector<2x16x128xbf16>
    %cst_8 = arith.constant 0.000000e+00 : bf16
    %17 = vector.broadcast %cst_8 : bf16 to vector<2x1x128xbf16>
    %18 = vector.extract_strided_slice %16 {offsets = [0, 0, 0], sizes = [2, 15, 128], strides = [1, 1, 1]} : vector<2x16x128xbf16> to vector<2x15x128xbf16>
    %19 = tpu.concatenate %17, %18 in 1 : vector<2x1x128xbf16>, vector<2x15x128xbf16> -> vector<2x16x128xbf16>
    %20 = vector.extract_strided_slice %16 {offsets = [0, 1, 0], sizes = [2, 15, 128], strides = [1, 1, 1]} : vector<2x16x128xbf16> to vector<2x15x128xbf16>
    %21 = tpu.concatenate %20, %17 in 1 : vector<2x15x128xbf16>, vector<2x1x128xbf16> -> vector<2x16x128xbf16>
    %22 = tpu.concatenate %19, %16, %21, %0 in 2 : vector<2x16x128xbf16>, vector<2x16x128xbf16>, vector<2x16x128xbf16>, vector<2x16x64xbf16> -> vector<2x16x448xbf16>
    %23 = vector.shape_cast %22 : vector<2x16x448xbf16> to vector<32x448xbf16>
    %c0_9 = arith.constant 0 : index
    %c0_10 = arith.constant 0 : index
    %24 = vector.load %arg4[%c0_9, %c0_10] : memref<448x128xbf16, #tpu.memory_space<vmem>>, vector<448x128xbf16>
    %cst_11 = arith.constant dense<0.000000e+00> : vector<32x128xf32>
    %25 = tpu.matmul %23, %24, %cst_11 {dimension_numbers = #tpu.dot_dimension_numbers<[1], [0], [0], [1], [0, 0, 1, 1], [], []>} : vector<32x448xbf16>, vector<448x128xbf16>, vector<32x128xf32> -> vector<32x128xf32>
    %c0_12 = arith.constant 0 : index
    %c0_13 = arith.constant 0 : index
    %26 = vector.load %arg5[%c0_12, %c0_13] : memref<1x128xf32, #tpu.memory_space<vmem>>, vector<1x128xf32>
    %27 = vector.broadcast %26 : vector<1x128xf32> to vector<32x128xf32>
    %28 = arith.addf %25, %27 : vector<32x128xf32>
    %cst_14 = arith.constant 0.000000e+00 : f32
    %29 = vector.broadcast %cst_14 : f32 to vector<32x128xf32>
    %30 = arith.maximumf %28, %29 : vector<32x128xf32>
    %31 = arith.truncf %30 : vector<32x128xf32> to vector<32x128xbf16>
    %32 = vector.shape_cast %31 : vector<32x128xbf16> to vector<2x16x128xbf16>
    %c0_15 = arith.constant 0 : index
    %c0_16 = arith.constant 0 : index
    %c0_17 = arith.constant 0 : index
    %33 = vector.load %arg6[%c0_15, %c0_16, %c0_17] : memref<2x16x128xbf16, #tpu.memory_space<vmem>>, vector<2x16x128xbf16>
    tpu.vector_store %arg6[%c0_15, %c0_16, %c0_17], %32 {strides = array<i32>} : memref<2x16x128xbf16, #tpu.memory_space<vmem>>, vector<2x16x128xbf16>,
    return
  }
  func.func @transform_0(%arg0: i32) -> (i32, i32, i32) {
    %c0_i32 = arith.constant 0 : i32
    %c0_i32_0 = arith.constant 0 : i32
    %c0_i32_1 = arith.constant 0 : i32
    return %arg0, %c0_i32, %c0_i32_0 : i32, i32, i32
  }
  func.func @transform_1(%arg0: i32) -> (i32, i32) {
    %c0_i32 = arith.constant 0 : i32
    %c0_i32_0 = arith.constant 0 : i32
    %c0_i32_1 = arith.constant 0 : i32
    return %c0_i32, %c0_i32_0 : i32, i32
  }
  func.func @transform_2(%arg0: i32) -> (i32, i32) {
    %c0_i32 = arith.constant 0 : i32
    %c0_i32_0 = arith.constant 0 : i32
    %c0_i32_1 = arith.constant 0 : i32
    return %c0_i32, %c0_i32_0 : i32, i32
  }
  func.func @transform_3(%arg0: i32) -> (i32, i32) {
    %c0_i32 = arith.constant 0 : i32
    %c0_i32_0 = arith.constant 0 : i32
    %c0_i32_1 = arith.constant 0 : i32
    return %c0_i32, %c0_i32_0 : i32, i32
  }
  func.func @transform_4(%arg0: i32) -> (i32, i32) {
    %c0_i32 = arith.constant 0 : i32
    %c0_i32_0 = arith.constant 0 : i32
    %c0_i32_1 = arith.constant 0 : i32
    return %c0_i32, %c0_i32_0 : i32, i32
  }
  func.func @transform_5(%arg0: i32) -> (i32, i32, i32) {
    %c0_i32 = arith.constant 0 : i32
    %c0_i32_0 = arith.constant 0 : i32
    %c0_i32_1 = arith.constant 0 : i32
    return %arg0, %c0_i32, %c0_i32_0 : i32, i32, i32
  }
}

</mosaic_0001>

<bundles_post_ra>
// kernel: tpu_custom_call.1
= control target key start
LH: loop header
LB: loop body
LE: loop exit
PB: predicated region body
PF: predicated region fallthrough
CT: control target
= control target key end

     0   :  { %10 = vsyncpa [#allocation3], 0  ;;  %s1106_s0 = inlined_call_operand.hbm [shape: bf16[2,16,64], index: 0, kind: input, shape index: {}]   ;;  %s1107_s1 = inlined_call_operand.hbm [shape: bf16[192,128], index: 1, kind: input, shape index: {}]   ;;  %s1108_s2 = inlined_call_operand.vmem [shape: f32[1,128], index: 2, kind: input, shape index: {}]   ;;  %s1109_s3 = inlined_call_operand.hbm [shape: bf16[448,128], index: 3, kind: input, shape index: {}]   ;;  %s1110_s4 = inlined_call_operand.vmem [shape: f32[1,128], index: 4, kind: input, shape index: {}]   ;;  %s1111_s5 = inlined_call_operand.hbm [shape: bf16[2,16,128], index: 5, kind: output, shape index: {}]  }
   0x1   :  { %11 = vsyncpa [#allocation6], 0 }
   0x2   :  { %12 = vsyncpa [#allocation4], 0  ;;  %s925_s18 = smov [#allocation5]   ;;  %s926_s20 = smov [#allocation2]  }
   0x3   :  { %s30_s19 = sshll.u32 %s925_s18, 4  ;;  %s18_s21 = sshll.u32 %s926_s20, 4  ;;  %s31_s19 = int_to_ptr.vmem [resolvable:$true] %s30_s19  ;;  %s962_s21 = int_to_ptr.vmem [resolvable:$true] %s18_s21 }
   0x4   :  { %s831_s24 = scalar_lea.hbm %s1107_s1, 1536 }
   0x5   :  { %p832_p0 = scmp.ne.s32.totalorder %s1107_s1, %s831_s24  ;;  %p835_p1 = scmp.lt.u32.totalorder %s831_s24, %s1107_s1 }
   0x7   :  { %p837_p2 = pnand %p835_p1, %p832_p0 }
   0x9   :  { %840 = shalt.err (!%p837_p2)
}
   0xa   :  { %s841_s29 = scalar_lea.vmem %s31_s19, 1536  ;;  %p846_p4 = scmp.lt.s32.totalorder %s31_s19, %s31_s19 }
   0xb   :  { %p842_p3 = scmp.ne.s32.totalorder %s31_s19, %s841_s29  ;;  %p847_p5 = scmp.lt.s32.totalorder %s841_s29, %s841_s29 }
   0xd   :  { %p848_p6 = por %p847_p5, %p846_p4 }
   0xf   :  { %p849_p7 = pnand %p848_p6, %p842_p3 }
  0x11   :  { %852 = shalt.err (!%p849_p7)
}
  0x12   :  { %s927_s30 = smov 64   ;;  %s928_s6 = smov 4  }
  0x13   :  { %36 = dma.hbm_to_vmem [thread:$0]  %s1107_s1, 1536, %s31_s19, [#allocation6], %s927_s30, %s927_s30, %s928_s6  }
  0x14   :  { %s853_s11 = scalar_lea.hbm %s1106_s0, 256 }
  0x15   :  { %p854_p8 = scmp.ne.s32.totalorder %s1106_s0, %s853_s11  ;;  %p857_p9 = scmp.lt.u32.totalorder %s853_s11, %s1106_s0 }
  0x17   :  { %p859_p10 = pnand %p857_p9, %p854_p8 }
  0x19   :  { %862 = shalt.err (!%p859_p10)
}
  0x1a   :  { %s863_s16 = scalar_lea.vmem %s962_s21, 256  ;;  %p868_p12 = scmp.lt.s32.totalorder %s962_s21, %s962_s21 }
  0x1b   :  { %p864_p11 = scmp.ne.s32.totalorder %s962_s21, %s863_s16  ;;  %p869_p13 = scmp.lt.s32.totalorder %s863_s16, %s863_s16 }
  0x1d   :  { %p870_p0 = por %p869_p13, %p868_p12 }
  0x1f   :  { %p871_p1 = pnand %p870_p0, %p864_p11 }
  0x21   :  { %874 = shalt.err (!%p871_p1)
}
  0x22   :  { %24 = dma.hbm_to_vmem [thread:$0]  %s1106_s0, 256, %s962_s21, [#allocation3], %s927_s30, %s927_s30, %s928_s6  }
  0x23   :  { %s929_s18 = smov [#allocation7]   ;;  %s875_s23 = scalar_lea.hbm %s1109_s3, 3584 }
  0x24   :  { %s44_s19 = sshll.u32 %s929_s18, 4  ;;  %p876_p2 = scmp.ne.s32.totalorder %s1109_s3, %s875_s23  ;;  %s45_s19 = int_to_ptr.vmem [resolvable:$true] %s44_s19 }
  0x25   :  { %p879_p3 = scmp.lt.u32.totalorder %s875_s23, %s1109_s3 }
  0x27   :  { %p881_p4 = pnand %p879_p3, %p876_p2 }
  0x29   :  { %884 = shalt.err (!%p881_p4)
}
  0x2a   :  { %s885_s28 = scalar_lea.vmem %s45_s19, 3584  ;;  %p890_p6 = scmp.lt.s32.totalorder %s45_s19, %s45_s19 }
  0x2b   :  { %p886_p5 = scmp.ne.s32.totalorder %s45_s19, %s885_s28  ;;  %p891_p7 = scmp.lt.s32.totalorder %s885_s28, %s885_s28 }
  0x2d   :  { %p892_p8 = por %p891_p7, %p890_p6 }
  0x2f   :  { %p893_p9 = pnand %p892_p8, %p886_p5 }
  0x31   :  { %896 = shalt.err (!%p893_p9)
}
  0x32   :  { %50 = dma.hbm_to_vmem [thread:$0]  %s1109_s3, 3584, %s45_s19, [#allocation6], %s927_s30, %s927_s30, %s928_s6  }
  0x33   :  { %919 = dma.done.wait [#allocation3], 256  }
  0x34   :  { %920 = vsyncadd [#allocation3], 4294967040 }
  0x35   :  { %921 = dma.done.wait [#allocation6], 5120  }
  0x36   :  { %922 = vsyncadd [#allocation6], 4294962176  ;;  %v930_v0 = vmov 0   ;;  %vm105_vm0 = vsmask.f32 7424  ;;  %v1015_v1 = vld [vmem:[#allocation2] sm:$0xff]  }
  0x37   :  { %231 = vmatprep.subr.bf16.mxu0 %v930_v0  ;;  %v1017_v2 = vld [vmem:[#allocation2 + $0x8] sm:$0xff]   ;;  %109 = vrot.lane.b32.xlu0 %v1015_v1, %s927_s30  ;;  %v791_v3 = vld [vmem:[#allocation5] sm:$0xff]   ;;  %v78_v4 = vshrl.u32 %v1015_v1, 16  ;;  %v81_v5 = vshll.u32 %v1015_v1, 16  ;;  %vm104_vm1 = vcmask 1047552   ;;  %v792_v6 = vld [vmem:[#allocation5 + $0x8] sm:$0xff]  }
  0x38   :  { %232 = vmatpush1.bf16.msra.mxu0 %v791_v3  ;;  %vm1026_vm2 = vmand %vm104_vm1, %vm105_vm0  ;;  %vm113_vm3 = vcmask 523264   ;;  %v793_v12 = vld [vmem:[#allocation5 + $0x10] sm:$0xff]   ;;  %v794_v14 = vld [vmem:[#allocation5 + $0x18] sm:$0xff]   ;;  %v88_v32 = vshll.u32 %v1017_v2, 16  ;;  %vm93_vm4 = vcmask 1040384   ;;  %v85_v33 = vshrl.u32 %v1017_v2, 16 }
  0x39   :  { %v80_v7 = vrot.slane %v78_v4, 7  ;;  %233 = vmatprep.subr.bf16.mxu0 %v930_v0  ;;  %v98_v8 = vrot.slane %v81_v5, 1  ;;  %v795_v15 = vld [vmem:[#allocation5 + $0x20] sm:$0xff]   ;;  %v805_v18 = vld [vmem:[#allocation7 + $0x48] sm:$0xff]   ;;  %v807_v20 = vld [vmem:[#allocation7 + $0x50] sm:$0xff]  }
  0x3a   :  { %v803_v16 = vld [vmem:[#allocation7 + $0x40] sm:$0xff]   ;;  %v806_v19 = vld [vmem:[#allocation7 + $0x8] sm:$0xff]   ;;  %v808_v22 = vld [vmem:[#allocation7 + $0x10] sm:$0xff]   ;;  %vm94_vm5 = vsmask.f32 256  ;;  %v100_v34 = vrot.slane %v88_v32, 1 }
  0x3b   :  { %111 = vrot.lane.b32.xlu0 %v1017_v2, %s927_s30  ;;  %v1030_v10 = vor.u32 %v81_v5, %v80_v7  ;;  %v99_v11 = vor.u32 %v98_v8, %v78_v4  ;;  %v804_v17 = vld [vmem:[#allocation7] sm:$0xff]   ;;  %754 = vmatprep.subr.bf16.mxu1 %v803_v16  ;;  %v796_v21 = vld [vmem:[#allocation5 + $0x28] sm:$0xff]   ;;  %v797_v23 = vld [vmem:[#allocation5 + $0x30] sm:$0xff]   ;;  %v87_v37 = vrot.slane %v85_v33, 7 }
  0x3c   :  { %234 = vmatpush1.bf16.msra.mxu0 %v792_v6  ;;  %755 = vmatpush3.bf16.msra.mxu1 %v804_v17  ;;  %v809_v24 = vld [vmem:[#allocation7 + $0x58] sm:$0xff]   ;;  %v811_v26 = vld [vmem:[#allocation7 + $0x60] sm:$0xff]   ;;  %v800_v29 = vld [vmem:[#allocation5 + $0x48] sm:$0xff]   ;;  %v101_v36 = vor.u32 %v100_v34, %v85_v33 }
  0x3d   :  { %235 = vmatprep.subr.bf16.mxu0 %v930_v0  ;;  %v107_v13 = vsel %vm1026_vm2, %v99_v11, 0  ;;  %756 = vmatprep.subr.bf16.mxu1 %v805_v18  ;;  %v810_v25 = vld [vmem:[#allocation7 + $0x18] sm:$0xff]   ;;  %v799_v28 = vld [vmem:[#allocation5 + $0x40] sm:$0xff]   ;;  %v801_v30 = vld [vmem:[#allocation5 + $0x50] sm:$0xff]   ;;  %v90_v41 = vor.u32 %v88_v32, %v87_v37 }
  0x3e   :  { %702 = vmatprep.mubr.msk.bf16.mxu0 %vm113_vm3, %v107_v13  ;;  %v798_v27 = vld [vmem:[#allocation5 + $0x38] sm:$0xff]   ;;  %vm1047_vm6 = vmand %vm93_vm4, %vm94_vm5  ;;  %v108_v40 = vsel %vm1026_vm2, %v101_v36, 0  ;;  %v812_v46 = vld [vmem:[#allocation7 + $0x20] sm:$0xff]  }
  0x3f   :  { %v802_v31 = vld [vmem:[#allocation5 + $0x58] sm:$0xff]   ;;  %v96_v38 = vsel %vm1047_vm6, 0, %v1030_v10  ;;  %v97_v44 = vsel %vm1047_vm6, 0, %v90_v41  ;;  %v813_v47 = vld [vmem:[#allocation7 + $0x68] sm:$0xff]   ;;  %v815_v49 = vld [vmem:[#allocation7 + $0x70] sm:$0xff]  }
  0x40   :  { %236 = vmatpush1.bf16.msra.mxu0 %v793_v12  ;;  %757 = vmatpush3.bf16.msra.mxu1 %v806_v19  ;;  %v814_v48 = vld [vmem:[#allocation7 + $0x28] sm:$0xff]   ;;  %v816_v50 = vld [vmem:[#allocation7 + $0x30] sm:$0xff]   ;;  %v817_v51 = vld [vmem:[#allocation7 + $0x78] sm:$0xff]  }
  0x41   :  { %237 = vmatprep.subr.bf16.mxu0 %v930_v0  ;;  %758 = vmatprep.subr.bf16.mxu1 %v807_v20  ;;  %v818_v52 = vld [vmem:[#allocation7 + $0x38] sm:$0xff]   ;;  %v689_v53 = vld [vmem:[%s1108_s2] ss:$0 sm:$0xff]  ;;  %v820_v18 = vld [vmem:[#allocation7 + $0x88] sm:$0xff]  }
  0x42   :  { %v830_v33 = vld [vmem:[#allocation7 + $0xd8] sm:$0xff]  }
  0x44   :  { %238 = vmatpush1.bf16.msra.mxu0 %v794_v14  ;;  %759 = vmatpush3.bf16.msra.mxu1 %v808_v22  ;;  %v819_v14 = vld [vmem:[#allocation7 + $0x80] sm:$0xff]   ;;  %v821_v22 = vld [vmem:[#allocation7 + $0x90] sm:$0xff]  }
  0x45   :  { %239 = vmatprep.subr.bf16.mxu0 %v930_v0  ;;  %760 = vmatprep.subr.bf16.mxu1 %v809_v24 }
  0x48   :  { %240 = vmatpush1.bf16.msra.mxu0 %v795_v15  ;;  %761 = vmatpush3.bf16.msra.mxu1 %v810_v25  ;;  %v822_v25 = vld [vmem:[#allocation7 + $0x98] sm:$0xff]  }
  0x49   :  { %241 = vmatprep.subr.bf16.mxu0 %v930_v0  ;;  %762 = vmatprep.subr.bf16.mxu1 %v811_v26  ;;  %v823_v26 = vld [vmem:[#allocation7 + $0xa0] sm:$0xff]  }
  0x4c   :  { %242 = vmatpush1.bf16.msra.mxu0 %v796_v21  ;;  %763 = vmatpush3.bf16.msra.mxu1 %v812_v46 }
  0x4d   :  { %243 = vmatprep.subr.bf16.mxu0 %v930_v0  ;;  %764 = vmatprep.subr.bf16.mxu1 %v813_v47 }
  0x50   :  { %244 = vmatpush1.bf16.msra.mxu0 %v797_v23  ;;  %765 = vmatpush3.bf16.msra.mxu1 %v814_v48 }
  0x51   :  { %245 = vmatprep.subr.bf16.mxu0 %v930_v0  ;;  %766 = vmatprep.subr.bf16.mxu1 %v815_v49 }
  0x54   :  { %246 = vmatpush1.bf16.msra.mxu0 %v798_v27  ;;  %767 = vmatpush3.bf16.msra.mxu1 %v816_v50  ;;  %v824_v27 = vld [vmem:[#allocation7 + $0xa8] sm:$0xff]  }
  0x55   :  { %247 = vmatprep.subr.bf16.mxu0 %v930_v0  ;;  %768 = vmatprep.subr.bf16.mxu1 %v817_v51 }
  0x58   :  { %248 = vmatpush1.bf16.msra.mxu0 %v799_v28  ;;  %769 = vmatpush3.bf16.msra.mxu1 %v818_v52  ;;  %v825_v28 = vld [vmem:[#allocation7 + $0xb0] sm:$0xff]  }
  0x59   :  { %249 = vmatprep.subr.bf16.mxu0 %v930_v0  ;;  %596 = vmatprep.subr.bf16.mxu1 %v930_v0 }
  0x5c   :  { %250 = vmatpush1.bf16.msra.mxu0 %v800_v29  ;;  %v826_v29 = vld [vmem:[#allocation7 + $0xb8] sm:$0xff]  }
  0x5d   :  { %251 = vmatprep.subr.bf16.mxu0 %v930_v0 }
  0x60   :  { %252 = vmatpush1.bf16.msra.mxu0 %v801_v30  ;;  %v828_v30 = vld [vmem:[#allocation7 + $0xc8] sm:$0xff]  }
  0x61   :  { %253 = vmatprep.subr.bf16.mxu0 %v930_v0 }
  0x64   :  { %254 = vmatpush1.bf16.msra.mxu0 %v802_v31  ;;  %v829_v31 = vld [vmem:[#allocation7 + $0xd0] sm:$0xff]  }
  0xa9   :  { %v110_v39 = vpop.permute.xlu0 %109 }
  0xaa   :  { %v116_v42 = vsel %vm113_vm3, %v96_v38, %v110_v39 }
  0xab   :  { %264 = vmatmul.mubr.bf16.vlgmr.msra.gmra.mrb[0].mxu0 %v116_v42 }
  0xac   :  { %703 = vmatprep.mubr.msk.bf16.mxu0 %vm113_vm3, %v108_v40 }
  0xad   :  { %v112_v43 = vpop.permute.xlu0 %111 }
  0xae   :  { %v120_v45 = vsel %vm113_vm3, %v97_v44, %v112_v43 }
  0xb3   :  { %272 = vmatmul.mubr.bf16.gmra.mrb[4].mxu0 %v120_v45 }
 0x17e   :  { %v265_v54 = vpop.f32.mrb[0].mxu0 }
 0x17f   :  { %v266_v55 = vadd.f32 %v689_v53, %v265_v54  ;;  %v267_v56 = vpop.f32.mrb[1].mxu0 }
 0x180   :  { %v268_v57 = vpop.f32.mrb[2].mxu0 }
 0x181   :  { %v269_v58 = vadd.f32 %v689_v53, %v268_v57  ;;  %v270_v59 = vpop.f32.mrb[3].mxu0  ;;  %v280_v60 = vmax.f32 %v266_v55, 0.0 }
 0x183   :  { %v281_v61 = vmax.f32 %v269_v58, 0.0 }
 0x185   :  { %v284_v62 = vpack.c.bf16 %v281_v61, %v280_v60 }
 0x186   :  { %v273_v63 = vpop.f32.mrb[4].mxu0 }
 0x187   :  { %v287_v3 = vshrl.u32 %v284_v62, 16  ;;  %579 = vmatprep.mubr.bf16.mxu1 %v284_v62  ;;  %v274_v4 = vadd.f32 %v689_v53, %v273_v63  ;;  %v275_v5 = vpop.f32.mrb[5].mxu0  ;;  %v290_v8 = vshll.u32 %v284_v62, 16 }
 0x188   :  { %v276_v6 = vpop.f32.mrb[6].mxu0 }
 0x189   :  { %v289_v7 = vrot.slane %v287_v3, 7  ;;  %v282_v10 = vmax.f32 %v274_v4, 0.0  ;;  %v277_v11 = vadd.f32 %v689_v53, %v276_v6  ;;  %v278_v12 = vpop.f32.mrb[7].mxu0  ;;  %v304_v32 = vrot.slane %v290_v8, 1 }
 0x18b   :  { %v292_v13 = vor.u32 %v290_v8, %v289_v7  ;;  %v283_v15 = vmax.f32 %v277_v11, 0.0  ;;  %v305_v34 = vor.u32 %v304_v32, %v287_v3 }
 0x18d   :  { %v302_v16 = vsel %vm1047_vm6, 0, %v292_v13  ;;  %v285_v17 = vpack.c.bf16 %v283_v15, %v282_v10  ;;  %v310_v35 = vsel %vm1026_vm2, %v305_v34, 0 }
 0x18e   :  { %580 = vmatmul.mubr.bf16.vlgmr.msra.gmra.mrb[0].mxu1 %v302_v16 }
 0x18f   :  { %597 = vmatpush1.bf16.msra.mxu1 %v819_v14  ;;  %v294_v19 = vshrl.u32 %v285_v17, 16  ;;  %587 = vmatprep.mubr.bf16.mxu1 %v285_v17  ;;  %v297_v20 = vshll.u32 %v285_v17, 16 }
 0x190   :  { %598 = vmatprep.subr.bf16.mxu1 %v930_v0 }
 0x191   :  { %v296_v21 = vrot.slane %v294_v19, 7  ;;  %v306_v36 = vrot.slane %v297_v20, 1 }
 0x193   :  { %599 = vmatpush1.bf16.msra.mxu1 %v820_v18  ;;  %v299_v23 = vor.u32 %v297_v20, %v296_v21  ;;  %v307_v37 = vor.u32 %v306_v36, %v294_v19 }
 0x194   :  { %600 = vmatprep.subr.bf16.mxu1 %v930_v0 }
 0x195   :  { %v303_v24 = vsel %vm1047_vm6, 0, %v299_v23  ;;  %v311_v38 = vsel %vm1026_vm2, %v307_v37, 0 }
 0x196   :  { %588 = vmatmul.mubr.bf16.gmra.mrb[4].mxu1 %v303_v24 }
 0x197   :  { %601 = vmatpush1.bf16.msra.mxu1 %v821_v22  ;;  %733 = vmatprep.mubr.msk.bf16.mxu1 %vm113_vm3, %v1015_v1  ;;  %v827_v1 = vld [vmem:[#allocation7 + $0xc0] sm:$0xff]  }
 0x198   :  { %602 = vmatprep.subr.bf16.mxu1 %v930_v0 }
 0x19b   :  { %603 = vmatpush1.bf16.msra.mxu1 %v822_v25 }
 0x19c   :  { %604 = vmatprep.subr.bf16.mxu1 %v930_v0 }
 0x19f   :  { %605 = vmatpush1.bf16.msra.mxu1 %v823_v26 }
 0x1a0   :  { %606 = vmatprep.subr.bf16.mxu1 %v930_v0 }
 0x1a3   :  { %607 = vmatpush1.bf16.msra.mxu1 %v824_v27 }
 0x1a4   :  { %608 = vmatprep.subr.bf16.mxu1 %v930_v0 }
 0x1a7   :  { %609 = vmatpush1.bf16.msra.mxu1 %v825_v28 }
 0x1a8   :  { %610 = vmatprep.subr.bf16.mxu1 %v930_v0 }
 0x1ab   :  { %611 = vmatpush1.bf16.msra.mxu1 %v826_v29 }
 0x1ac   :  { %612 = vmatprep.subr.bf16.mxu1 %v930_v0 }
 0x1af   :  { %613 = vmatpush1.bf16.msra.mxu1 %v827_v1 }
 0x1b0   :  { %614 = vmatprep.subr.bf16.mxu1 %v930_v0 }
 0x1b3   :  { %615 = vmatpush1.bf16.msra.mxu1 %v828_v30 }
 0x1b4   :  { %616 = vmatprep.subr.bf16.mxu1 %v930_v0 }
 0x1b7   :  { %617 = vmatpush1.bf16.msra.mxu1 %v829_v31 }
 0x1b8   :  { %618 = vmatprep.subr.bf16.mxu1 %v930_v0 }
 0x1bb   :  { %619 = vmatpush1.bf16.msra.mxu1 %v830_v33 }
 0x1be   :  { %629 = vmatmul.mubr.bf16.vlgmr.msra.gmra.mrb[8].mxu1 %v310_v35 }
 0x1bf   :  { %734 = vmatprep.mubr.msk.bf16.mxu1 %vm113_vm3, %v1017_v2  ;;  %v704_v2 = vld [vmem:[%s1110_s4] ss:$0 sm:$0xff]  ;;  %s931_s4 = smov [#allocation8]  }
 0x1c0   :  { %s674_s8 = sshll.u32 %s931_s4, 4  ;;  %s675_s8 = int_to_ptr.vmem [resolvable:$true] %s674_s8 }
 0x1c1   :  { %s897_s9 = scalar_lea.vmem %s675_s8, 256  ;;  %p902_p11 = scmp.lt.s32.totalorder %s675_s8, %s675_s8 }
 0x1c2   :  { %p898_p10 = scmp.ne.s32.totalorder %s675_s8, %s897_s9  ;;  %p903_p12 = scmp.lt.s32.totalorder %s897_s9, %s897_s9 }
 0x1c4   :  { %p904_p13 = por %p903_p12, %p902_p11 }
 0x1c6   :  { %637 = vmatmul.mubr.bf16.gmra.mrb[12].mxu1 %v311_v38  ;;  %p905_p0 = pnand %p904_p13, %p898_p10 }
 0x261   :  { %v770_v39 = vpop.f32.mrb[0].mxu1 }
 0x262   :  { %v771_v40 = vpop.f32.mrb[1].mxu1 }
 0x263   :  { %v772_v41 = vadd.f32 %v771_v40, %v770_v39  ;;  %v773_v42 = vpop.f32.mrb[2].mxu1 }
 0x264   :  { %v774_v0 = vpop.f32.mrb[3].mxu1 }
 0x265   :  { %v775_v43 = vadd.f32 %v774_v0, %v773_v42  ;;  %v582_v50 = vadd.f32 %v772_v41, %v704_v2 }
 0x267   :  { %v585_v53 = vadd.f32 %v775_v43, %v704_v2 }
 0x269   :  { %v776_v44 = vpop.f32.mrb[4].mxu1 }
 0x26a   :  { %v777_v45 = vpop.f32.mrb[5].mxu1 }
 0x26b   :  { %v778_v46 = vadd.f32 %v777_v45, %v776_v44  ;;  %v779_v47 = vpop.f32.mrb[6].mxu1 }
 0x26c   :  { %v780_v48 = vpop.f32.mrb[7].mxu1 }
 0x26d   :  { %v781_v49 = vadd.f32 %v780_v48, %v779_v47  ;;  %v590_v60 = vadd.f32 %v778_v46, %v704_v2 }
 0x26f   :  { %v593_v3 = vadd.f32 %v781_v49, %v704_v2 }
 0x291   :  { %v630_v9 = vpop.f32.mrb[8].mxu1 }
 0x292   :  { %v631_v51 = vadd.f32 %v630_v9, %v582_v50  ;;  %v632_v52 = vpop.f32.mrb[9].mxu1 }
 0x293   :  { %v633_v54 = vpop.f32.mrb[10].mxu1 }
 0x294   :  { %v634_v55 = vadd.f32 %v633_v54, %v585_v53  ;;  %v635_v56 = vpop.f32.mrb[11].mxu1  ;;  %v645_v57 = vmax.f32 %v631_v51, 0.0 }
 0x296   :  { %v646_v58 = vmax.f32 %v634_v55, 0.0 }
 0x298   :  { %v746_v59 = vpack.c.bf16 %v646_v58, %v645_v57 }
 0x299   :  { %v638_v61 = vpop.f32.mrb[12].mxu1 }
 0x29a   :  { %747 = vst [vmem:[#allocation8] sm:$0xff] %v746_v59   ;;  %v639_v62 = vadd.f32 %v638_v61, %v590_v60  ;;  %v640_v63 = vpop.f32.mrb[13].mxu1 }
 0x29b   :  { %v641_v4 = vpop.f32.mrb[14].mxu1 }
 0x29c   :  { %v642_v5 = vadd.f32 %v641_v4, %v593_v3  ;;  %v643_v6 = vpop.f32.mrb[15].mxu1  ;;  %v647_v7 = vmax.f32 %v639_v62, 0.0 }
 0x29e   :  { %v648_v8 = vmax.f32 %v642_v5, 0.0 }
 0x2a0   :  { %v751_v10 = vpack.c.bf16 %v648_v8, %v647_v7 }
 0x2a2   :  { %753 = vst [vmem:[#allocation8 + $0x8] sm:$0xff] %v751_v10  }
 0x2a3   :  { %908 = shalt.err (!%p905_p0)
}
 0x2a4   :  { %s909_s12 = scalar_lea.hbm %s1111_s5, 256 }
 0x2a5   :  { %p910_p1 = scmp.ne.s32.totalorder %s1111_s5, %s909_s12  ;;  %p913_p2 = scmp.lt.u32.totalorder %s909_s12, %s1111_s5 }
 0x2a7   :  { %p915_p3 = pnand %p913_p2, %p910_p1 }
 0x2a9   :  { %918 = shalt.err (!%p915_p3)
}
 0x2aa   :  { %680 = dma.vmem_to_hbm [thread:$0]  %s675_s8, 256, %s1111_s5, [#allocation4], %s927_s30, %s927_s30, %s928_s6  }
 0x2ab   :  { %923 = dma.done.wait [#allocation4], 256  }
 0x2ac   :  { %924 = vsyncadd [#allocation4], 4294967040 }
 0x2ad   :  { %684 = vsyncpa [#allocation3], 1 }
 0x2ae   :  { %685 = vsyncpa [#allocation6], 1 }
 0x2af   :  { %686 = vsyncpa [#allocation4], 1 }

</bundles_post_ra>
